<compile_context>
chip_gen: v7x
topology: tpu7x:2x2x1
jax: 0.10.0
libtpu: 0.0.40
codegen_flags: <defaults>
</compile_context>

<pallas_src>
import jax
import jax.numpy as jnp
from jax.experimental import pallas as pl
from jax.experimental.pallas import tpu as pltpu

# Problem sizes (small, consistent with a conv component on NCHW input).
N, H, W = 2, 16, 16
CIN, COUT, K = 4, 8, 3
EPS = 1e-5

M = N * H * W            # 512 output pixels -> lane-dense last dim (mult of 128)
KDIM = K * K * CIN       # 36  contraction dim
TM = M                   # one tile: whole problem in a single grid step


def matmul_bias_relu_kernel(w_ref, p_ref, b_ref, o_ref):
    """One MXU matmul: folded conv weights x im2col patches, + bias + ReLU.

    w_ref: (COUT, KDIM)  bf16 conv weights with BN scale folded
    p_ref: (KDIM, TM)    bf16 im2col patches, transposed (lane-dense on pixels)
    b_ref: (COUT, 1)     f32 folded BN bias
    o_ref: (COUT, TM)    f32 output; TM % 128 == 0 -> unmasked vst
    """
    acc = jnp.dot(w_ref[...], p_ref[...], preferred_element_type=jnp.float32)
    o_ref[...] = jnp.maximum(acc + b_ref[...], 0.0).astype(o_ref.dtype)


def conv_bn_relu_component(params):
    """Returns component(x_nchw) -> y_nchw backed by the Pallas kernel."""
    w, gamma, beta, mean, var = (params[k] for k in ("w", "gamma", "beta", "mean", "var"))

    # Fold BatchNorm (eval mode) into the conv weights + a per-channel bias.
    scale = gamma / jnp.sqrt(var + EPS)                       # (COUT,)
    bias = beta - mean * scale                                # (COUT,)

    # PyTorch conv weight (COUT, CIN, Kh, Kw) -> rows ordered (kh, kw, cin),
    # BN scale folded in f32, then transposed to (COUT, KDIM) and cast to bf16
    # for the MXU (accumulation stays f32 inside the kernel).
    w_flat = jnp.transpose(w, (2, 3, 1, 0)).reshape(KDIM, COUT) * scale[None, :]
    w_t = w_flat.T.astype(jnp.bfloat16)                       # (8, 36)
    b_col = bias.reshape(COUT, 1).astype(jnp.float32)         # (8, 1)

    grid = (pl.cdiv(M, TM),)   # = (1,); TM == M so no partial-tile masking needed
    cost = pl.CostEstimate(
        flops=2 * M * KDIM * COUT,
        transcendentals=0,
        bytes_accessed=KDIM * M * 2 + COUT * KDIM * 2 + COUT * 4 + COUT * M * 4,
    )

    call = pl.pallas_call(
        matmul_bias_relu_kernel,
        out_shape=jax.ShapeDtypeStruct((COUT, M), jnp.float32),
        grid_spec=pltpu.PrefetchScalarGridSpec(
            num_scalar_prefetch=0,
            grid=grid,
            in_specs=[
                pl.BlockSpec((COUT, KDIM), lambda i: (0, 0)),   # weights (resident)
                pl.BlockSpec((KDIM, TM), lambda i: (0, i)),     # patches^T
                pl.BlockSpec((COUT, 1), lambda i: (0, 0)),      # bias (resident)
            ],
            out_specs=pl.BlockSpec((COUT, TM), lambda i: (0, i)),
        ),
        compiler_params=pltpu.CompilerParams(
            dimension_semantics=("arbitrary",)),
        cost_estimate=cost,
    )

    @jax.jit
    def component(x_nchw):
        # Layout + halo + im2col prepared in the (jit-fused) wrapper so every
        # in-kernel load is a dense, contiguous slab.
        # TODO(synk): at production sizes, move the halo gather / im2col inside
        # a tiled kernel (halo'd BlockSpecs or manual DMA) instead of
        # materializing the 9x-inflated patch matrix in HBM.
        x = jnp.transpose(x_nchw, (0, 2, 3, 1))                    # NCHW -> NHWC
        xp = jnp.pad(x, ((0, 0), (1, 1), (1, 1), (0, 0)))          # pad=1 halo
        patches = jnp.concatenate(
            [xp[:, kh:kh + H, kw:kw + W, :] for kh in range(K) for kw in range(K)],
            axis=-1,
        ).reshape(M, KDIM)                                         # (512, 36)
        patches_t = patches.T.astype(jnp.bfloat16)                 # (36, 512)

        out = call(w_t, patches_t, b_col)                          # (8, 512)
        out = out.reshape(COUT, N, H, W)                           # channel-major
        return jnp.transpose(out, (1, 0, 2, 3))                    # -> NCHW

    return component


class BaseComponent:
    """JAX mirror of vedastr BaseComponent: forward(x) = component(x)."""

    def __init__(self, from_layer, to_layer, component):
        self.from_layer = from_layer
        self.to_layer = to_layer
        self.component = component

    def __call__(self, x):
        return self.component(x)


def _reference(x_nchw, params):
    """Pure-JAX reference (lax conv) for correctness checking.

    Mirrors the kernel's bf16 MXU operands (f32 accumulation) so the tolerance
    stays tight.
    """
    w, gamma, beta, mean, var = (params[k] for k in ("w", "gamma", "beta", "mean", "var"))
    scale = gamma / jnp.sqrt(var + EPS)
    bias = beta - mean * scale
    w_folded = w * scale[:, None, None, None]

    x_b = x_nchw.astype(jnp.bfloat16).astype(jnp.float32)
    w_b = w_folded.astype(jnp.bfloat16).astype(jnp.float32)
    y = jax.lax.conv_general_dilated(
        x_b, w_b, window_strides=(1, 1), padding=((1, 1), (1, 1)),
        dimension_numbers=("NCHW", "OIHW", "NCHW"),
        precision=jax.lax.Precision.HIGHEST)
    return jnp.maximum(y + bias.reshape(1, COUT, 1, 1), 0.0)


if __name__ == "__main__":
    key = jax.random.PRNGKey(0)
    kx, kw_, kg, kb, km, kv = jax.random.split(key, 6)

    x = jax.random.normal(kx, (N, CIN, H, W), dtype=jnp.float32)
    params = {
        "w": jax.random.normal(kw_, (COUT, CIN, K, K), dtype=jnp.float32) * 0.1,
        "gamma": 1.0 + 0.1 * jax.random.normal(kg, (COUT,), dtype=jnp.float32),
        "beta": 0.1 * jax.random.normal(kb, (COUT,), dtype=jnp.float32),
        "mean": 0.1 * jax.random.normal(km, (COUT,), dtype=jnp.float32),
        "var": 0.5 + jnp.abs(jax.random.normal(kv, (COUT,), dtype=jnp.float32)),
    }

    module = BaseComponent(from_layer="c0", to_layer="c1",
                           component=conv_bn_relu_component(params))

    out = jax.block_until_ready(module(x))
    ref = jax.block_until_ready(_reference(x, params))

    assert out.shape == (N, COUT, H, W), out.shape
    max_err = float(jnp.max(jnp.abs(out - ref)))
    assert max_err < 1e-3, max_err

    print("KERNEL_OK")
</pallas_src>

<mosaic_0001>
module attributes {stable_mosaic.version = 11 : i64} {
  func.func @matmul_bias_relu_kernel(%arg0: i32, %arg1: memref<8x36xbf16, #tpu.memory_space<vmem>>, %arg2: memref<36x512xbf16, #tpu.memory_space<vmem>>, %arg3: memref<8x1xf32, #tpu.memory_space<vmem>>, %arg4: memref<8x512xf32, #tpu.memory_space<vmem>>) attributes {dimension_semantics = [#tpu.dimension_semantics<arbitrary>], iteration_bounds = array<i64: 1>, scalar_prefetch = 0 : i64, scratch_operands = 0 : i64, tpu.core_type = #tpu.core_type<tc>, window_params = [{pipeline_mode = #tpu.pipeline_mode<synchronous>, transform_indices = @transform_0, window_bounds = array<i64: 8, 36>}, {transform_indices = @transform_1, window_bounds = array<i64: 36, 512>}, {pipeline_mode = #tpu.pipeline_mode<synchronous>, transform_indices = @transform_2, window_bounds = array<i64: 8, 1>}, {transform_indices = @transform_3, window_bounds = array<i64: 8, 512>}]} {
    %c0 = arith.constant 0 : index
    %c0_0 = arith.constant 0 : index
    %0 = vector.load %arg1[%c0, %c0_0] : memref<8x36xbf16, #tpu.memory_space<vmem>>, vector<8x36xbf16>
    %c0_1 = arith.constant 0 : index
    %c0_2 = arith.constant 0 : index
    %1 = vector.load %arg2[%c0_1, %c0_2] : memref<36x512xbf16, #tpu.memory_space<vmem>>, vector<36x512xbf16>
    %cst = arith.constant dense<0.000000e+00> : vector<8x512xf32>
    %2 = tpu.matmul %0, %1, %cst {dimension_numbers = #tpu.dot_dimension_numbers<[1], [0], [0], [1], [0, 0, 1, 1], [], []>} : vector<8x36xbf16>, vector<36x512xbf16>, vector<8x512xf32> -> vector<8x512xf32>
    %c0_3 = arith.constant 0 : index
    %c0_4 = arith.constant 0 : index
    %3 = vector.load %arg3[%c0_3, %c0_4] : memref<8x1xf32, #tpu.memory_space<vmem>>, vector<8x1xf32>
    %4 = vector.broadcast %3 : vector<8x1xf32> to vector<8x512xf32>
    %5 = arith.addf %2, %4 : vector<8x512xf32>
    %cst_5 = arith.constant 0.000000e+00 : f32
    %6 = vector.broadcast %cst_5 : f32 to vector<8x512xf32>
    %7 = arith.maximumf %5, %6 : vector<8x512xf32>
    %c0_6 = arith.constant 0 : index
    %c0_7 = arith.constant 0 : index
    %8 = vector.load %arg4[%c0_6, %c0_7] : memref<8x512xf32, #tpu.memory_space<vmem>>, vector<8x512xf32>
    tpu.vector_store %arg4[%c0_6, %c0_7], %7 {strides = array<i32>} : memref<8x512xf32, #tpu.memory_space<vmem>>, vector<8x512xf32>,
    return
  }
  func.func @transform_0(%arg0: i32) -> (i32, i32) {
    %c0_i32 = arith.constant 0 : i32
    %c0_i32_0 = arith.constant 0 : i32
    %c0_i32_1 = arith.constant 0 : i32
    return %c0_i32, %c0_i32_0 : i32, i32
  }
  func.func @transform_1(%arg0: i32) -> (i32, i32) {
    %c0_i32 = arith.constant 0 : i32
    %c0_i32_0 = arith.constant 0 : i32
    return %c0_i32, %arg0 : i32, i32
  }
  func.func @transform_2(%arg0: i32) -> (i32, i32) {
    %c0_i32 = arith.constant 0 : i32
    %c0_i32_0 = arith.constant 0 : i32
    %c0_i32_1 = arith.constant 0 : i32
    return %c0_i32, %c0_i32_0 : i32, i32
  }
  func.func @transform_3(%arg0: i32) -> (i32, i32) {
    %c0_i32 = arith.constant 0 : i32
    %c0_i32_0 = arith.constant 0 : i32
    return %c0_i32, %arg0 : i32, i32
  }
}

</mosaic_0001>

<bundles_post_ra>
// kernel: component.1
= control target key start
LH: loop header
LB: loop body
LE: loop exit
PB: predicated region body
PF: predicated region fallthrough
CT: control target
= control target key end

     0   :  { %v227_v1 = vmov 0   ;;  %vm86_vm0 = vcmask 1041408   ;;  %vm82_vm1 = vcmask 293888   ;;  %s300_s1 = inlined_call_operand.vmem [shape: bf16[36,512], index: 1, kind: input, shape index: {}]   ;;  %s301_s2 = inlined_call_operand.vmem [shape: f32[8,1], index: 2, kind: input, shape index: {}]   ;;  %s302_s0 = inlined_call_operand.vmem [shape: bf16[8,36], index: 0, kind: input, shape index: {}]   ;;  %s303_s3 = inlined_call_operand.vmem [shape: f32[8,512], index: 3, kind: output, shape index: {}]  }
   0x1   :  { %v211_v0 = vld [vmem:[%s300_s1 + $0x4] ss:$16 sps:$4 sm:$0xff]   ;;  %131 = vmatprep.mubr.bf16.mxu0 %v227_v1  ;;  %172 = vmatprep.mubr.bf16.mxu1 %v227_v1  ;;  %v213_v2 = vld [vmem:[%s300_s1 + $0xc] ss:$16 sps:$4 sm:$0xff]   ;;  %v215_v3 = vld [vmem:[%s300_s1] ss:$16 sps:$4 sm:$0xff]  }
   0x2   :  { %210 = vset.pattern.permute.xlu0 %v227_v1  ;;  %99 = vmatprep.subr.bf16.mxu0 %v211_v0  ;;  %v216_v4 = vld [vmem:[%s300_s1 + $0x8] ss:$16 sps:$4 sm:$0xff]   ;;  %v217_v5 = vld [vmem:[%s300_s1 + $0x24] ss:$16 sps:$4 sm:$0xff]   ;;  %v219_v6 = vld [vmem:[%s300_s1 + $0x2c] ss:$16 sps:$4 sm:$0xff]  }
   0x3   :  { %140 = vmatprep.subr.bf16.mxu1 %v213_v2  ;;  %100 = vmatpush1.bf16.msra.mxu0 %v215_v3  ;;  %v221_v7 = vld [vmem:[%s300_s1 + $0x20] ss:$16 sps:$4 sm:$0xff]   ;;  %v222_v8 = vld [vmem:[%s300_s1 + $0x28] ss:$16 sps:$4 sm:$0xff]  }
   0x4   :  { %141 = vmatpush1.bf16.msra.mxu1 %v216_v4  ;;  %101 = vmatprep.subr.bf16.mxu0 %v217_v5  ;;  %v24_v9 = vld [vmem:[%s300_s1 + $0x40] sm:$0x33]  ;;  %v25_v10 = vld [vmem:[%s300_s1 + $0x48] sm:$0x33] }
   0x5   :  { %142 = vmatprep.subr.bf16.mxu1 %v219_v6  ;;  %v202_v11 = vcombine.high %v24_v9, %v24_v9  ;;  %v204_v12 = vcombine.high %v25_v10, %v25_v10  ;;  %v201_v13 = vcombine.low %v24_v9, %v24_v9  ;;  %v203_v14 = vcombine.low %v25_v10, %v25_v10  ;;  %v26_v15 = vld [vmem:[%s301_s2] sm:$0xff] }
   0x6   :  { %29 = vperm.xlu0 %210, %v26_v15   ;;  %v15_v18 = vld [vmem:[%s302_s0] sm:$0xf] }
   0x7   :  { %102 = vmatpush1.bf16.msra.mxu0 %v221_v7  ;;  %v88_v16 = vsel %vm86_vm0, %v201_v13, 0  ;;  %v94_v17 = vsel %vm86_vm0, %v203_v14, 0 }
   0x8   :  { %143 = vmatpush1.bf16.msra.mxu1 %v222_v8  ;;  %205 = vmatprep.subr.msk.bf16.mxu0 %vm86_vm0, %v202_v11 }
   0x9   :  { %207 = vmatprep.subr.msk.bf16.mxu1 %vm86_vm0, %v204_v12 }
   0xb   :  { %104 = vmatpush1.bf16.msra.mxu0 %v88_v16 }
   0xc   :  { %145 = vmatpush1.bf16.msra.mxu1 %v94_v17 }
   0xe   :  { %206 = vmatmul.mubr.msk.bf16.vlgmr.msra.gmra.mrb[0].mxu0 %vm82_vm1, %v15_v18 }
   0xf   :  { %208 = vmatmul.mubr.msk.bf16.vlgmr.msra.gmra.mrb[0].mxu1 %vm82_vm1, %v15_v18 }
  0x85   :  { %v30_v19 = vpop.permute.xlu0 %29 }
  0xe1   :  { %v133_v20 = vpop.f32.mrb[0].mxu0 }
  0xe2   :  { %v174_v21 = vpop.f32.mrb[0].mxu1  ;;  %v134_v22 = vadd.f32 %v133_v20, %v30_v19  ;;  %v135_v24 = vpop.f32.mrb[1].mxu0 }
  0xe3   :  { %v175_v23 = vadd.f32 %v174_v21, %v30_v19  ;;  %v176_v25 = vpop.f32.mrb[1].mxu1  ;;  %v136_v26 = vadd.f32 %v135_v24, %v30_v19  ;;  %v137_v28 = vpop.f32.mrb[2].mxu0 }
  0xe4   :  { %v177_v27 = vadd.f32 %v176_v25, %v30_v19  ;;  %v178_v29 = vpop.f32.mrb[2].mxu1  ;;  %v181_v30 = vmax.f32 %v134_v22, 0.0  ;;  %v138_v32 = vpop.f32.mrb[3].mxu0 }
  0xe5   :  { %v183_v31 = vmax.f32 %v175_v23, 0.0  ;;  %v179_v33 = vpop.f32.mrb[3].mxu1  ;;  %v182_v34 = vmax.f32 %v136_v26, 0.0 }
  0xe6   :  { %v184_v35 = vmax.f32 %v177_v27, 0.0  ;;  %185 = vst [vmem:[%s303_s3] sm:$0xff] %v181_v30 }
  0xe7   :  { %187 = vst [vmem:[%s303_s3 + $0x10] sm:$0xff] %v183_v31  ;;  %186 = vst [vmem:[%s303_s3 + $0x8] sm:$0xff] %v182_v34 }
  0xe8   :  { %188 = vst [vmem:[%s303_s3 + $0x18] sm:$0xff] %v184_v35 }

</bundles_post_ra>
